<compile_context>
chip_gen: v7x
topology: tpu7x:2x2x1
jax: 0.10.0
libtpu: 0.0.40
codegen_flags: <defaults>
</compile_context>

<pallas_src>
import jax
import jax.numpy as jnp
from jax.experimental import pallas as pl
from jax.experimental.pallas import tpu as pltpu

F_IN = 200        # flattened fan-in of fc1
H1, H2 = 5, 10
F_OUT = 100       # fc3 fan-out
F_OUT_PAD = 128   # lane-dense pad of the output dim (unmasked vst)
TB_MAX = 4096     # max batch-tile rows per grid step (multiple of 16)
MIN_SPLIT_B = 32  # batches at/above this are split into >=2 tiles (v7x megacore)


def fcnn_kernel(x_ref, w1_ref, b1_ref, w2_ref, b2_ref, w3_ref, b3_ref, o_ref):
    # x tile: (tb, 200) f32, read straight from HBM (no prepass).
    x = x_ref[...]
    # fc1 + ReLU   (f32 MXU accumulation; compute has huge slack)
    h1 = jnp.dot(x, w1_ref[...], preferred_element_type=jnp.float32) + b1_ref[...]
    h1 = jnp.maximum(h1, 0.0)                                        # (tb, 5)
    # fc2 + ReLU
    h2 = jnp.dot(h1, w2_ref[...], preferred_element_type=jnp.float32) + b2_ref[...]
    h2 = jnp.maximum(h2, 0.0)                                        # (tb, 10)
    # fc3 (no activation), output lane-padded 100->128 -> unmasked stores
    out = jnp.dot(h2, w3_ref[...], preferred_element_type=jnp.float32) + b3_ref[...]
    o_ref[...] = out.astype(o_ref.dtype)                             # (tb, 128)


def _cdiv(a, b):
    return (a + b - 1) // b


def _round_up(n, m):
    return _cdiv(n, m) * m


def _pick_tile(B):
    """Balanced batch tiling: multiple-of-16 rows, >=2 tiles for B>=32 (v7x)."""
    n_tiles = _cdiv(B, TB_MAX)
    if B >= MIN_SPLIT_B:
        n_tiles = max(n_tiles, 2)
    tb = _round_up(_cdiv(B, n_tiles), 16)
    b_pad = _round_up(B, tb)
    return tb, b_pad


def fcnn_forward(x, params, out_dtype=jnp.float32):
    """x: any shape (B, ...) flattening to (B, 200). Returns (B, 100) out_dtype."""
    B = x.shape[0]
    x2d = x.reshape(B, -1)                                   # glue: view(B, -1)
    assert x2d.shape[1] == F_IN, f"expected {F_IN} flattened features, got {x2d.shape[1]}"

    w1, b1, w2, b2, w3, b3 = params

    # ---- wrapper-side prep: only cheap batch padding + tiny weight pads ----
    tb, b_pad = _pick_tile(B)
    x_p = x2d if b_pad == B else jnp.pad(x2d, ((0, b_pad - B), (0, 0)))

    # fc3 weight/bias: zero-pad fan-out 100->128 (lane-dense output, tiny arrays)
    w3_p = jnp.zeros((H2, F_OUT_PAD), jnp.float32).at[:, :F_OUT].set(w3)
    b3_p = jnp.zeros((1, F_OUT_PAD), jnp.float32).at[:, :F_OUT].set(b3)

    grid = (b_pad // tb,)
    resident = lambda arr: pl.BlockSpec(arr.shape, lambda i: (0, 0))  # VMEM-resident params

    out = pl.pallas_call(
        fcnn_kernel,
        out_shape=jax.ShapeDtypeStruct((b_pad, F_OUT_PAD), out_dtype),
        grid=grid,
        in_specs=[
            # x: pipelined batch tiles; last dim = full extent (200) is legal.
            pl.BlockSpec((tb, F_IN), lambda i: (i, 0)),
            resident(w1), resident(b1),
            resident(w2), resident(b2),
            resident(w3_p), resident(b3_p),
        ],
        out_specs=pl.BlockSpec((tb, F_OUT_PAD), lambda i: (i, 0)),
        compiler_params=pltpu.CompilerParams(
            dimension_semantics=("parallel",),      # megacore-shard batch axis on v7x
            vmem_limit_bytes=40 * 1024 * 1024,      # fits TB=4096 double-buffered tiles, safe on v7x
        ),
    )(x_p, w1, b1, w2, b2, w3_p, b3_p)

    # NOTE: for consumers that tolerate padding, return `out` directly to skip
    # this slice copy (it is a full extra read+write of the output in XLA).
    return out[:B, :F_OUT]


def init_params(key):
    """Deterministic init mimicking PyTorch nn.Linear: U(-1/sqrt(fan_in), +1/sqrt(fan_in)).
    Weights stored as (in, out); biases as (1, out)."""
    sizes = [(F_IN, H1), (H1, H2), (H2, F_OUT)]
    params = []
    for (fin, fout) in sizes:
        key, kw, kb = jax.random.split(key, 3)
        bound = 1.0 / (fin ** 0.5)
        w = jax.random.uniform(kw, (fin, fout), jnp.float32, -bound, bound)
        b = jax.random.uniform(kb, (1, fout), jnp.float32, -bound, bound)
        params += [w, b]
    return tuple(params)


def _reference(x, params):
    """Plain-JAX f32 reference (matches the PyTorch FCNN forward)."""
    w1, b1, w2, b2, w3, b3 = params
    xr = x.reshape(x.shape[0], -1)
    h = jnp.maximum(xr @ w1 + b1, 0.0)
    h = jnp.maximum(h @ w2 + b2, 0.0)
    return h @ w3 + b3


if __name__ == "__main__":
    key = jax.random.PRNGKey(0)
    kp, kx, kx2 = jax.random.split(key, 3)
    params = init_params(kp)

    # Small example input: (batch=2, 4, 50) -> flattens to (2, 200).
    x = jax.random.normal(kx, (2, 4, 50), jnp.float32)
    y = fcnn_forward(x, params)
    jax.block_until_ready(y)
    assert y.shape == (2, F_OUT)
    assert jnp.allclose(y, _reference(x, params), atol=1e-3, rtol=1e-3)

    # Batch not a multiple of 16 and >= 32: exercises padding + 2-tile grid.
    x2 = jax.random.normal(kx2, (37, 200), jnp.float32)
    y2 = fcnn_forward(x2, params)
    jax.block_until_ready(y2)
    assert y2.shape == (37, F_OUT)
    assert jnp.allclose(y2, _reference(x2, params), atol=1e-3, rtol=1e-3)

    print("KERNEL_OK")
</pallas_src>

<mosaic_0001>
module attributes {stable_mosaic.version = 11 : i64} {
  func.func @fcnn_kernel(%arg0: i32, %arg1: memref<16x200xf32, #tpu.memory_space<vmem>>, %arg2: memref<200x5xf32, #tpu.memory_space<vmem>>, %arg3: memref<1x5xf32, #tpu.memory_space<vmem>>, %arg4: memref<5x10xf32, #tpu.memory_space<vmem>>, %arg5: memref<1x10xf32, #tpu.memory_space<vmem>>, %arg6: memref<10x128xf32, #tpu.memory_space<vmem>>, %arg7: memref<1x128xf32, #tpu.memory_space<vmem>>, %arg8: memref<16x128xf32, #tpu.memory_space<vmem>>) attributes {dimension_semantics = [#tpu.dimension_semantics<parallel>], iteration_bounds = array<i64: 1>, scalar_prefetch = 0 : i64, scratch_operands = 0 : i64, tpu.core_type = #tpu.core_type<tc>, window_params = [{transform_indices = @transform_0, window_bounds = array<i64: 16, 200>}, {pipeline_mode = #tpu.pipeline_mode<synchronous>, transform_indices = @transform_1, window_bounds = array<i64: 200, 5>}, {pipeline_mode = #tpu.pipeline_mode<synchronous>, transform_indices = @transform_2, window_bounds = array<i64: 1, 5>}, {pipeline_mode = #tpu.pipeline_mode<synchronous>, transform_indices = @transform_3, window_bounds = array<i64: 5, 10>}, {pipeline_mode = #tpu.pipeline_mode<synchronous>, transform_indices = @transform_4, window_bounds = array<i64: 1, 10>}, {pipeline_mode = #tpu.pipeline_mode<synchronous>, transform_indices = @transform_5, window_bounds = array<i64: 10, 128>}, {pipeline_mode = #tpu.pipeline_mode<synchronous>, transform_indices = @transform_6, window_bounds = array<i64: 1, 128>}, {transform_indices = @transform_7, window_bounds = array<i64: 16, 128>}]} {
    %c0 = arith.constant 0 : index
    %c0_0 = arith.constant 0 : index
    %0 = vector.load %arg1[%c0, %c0_0] : memref<16x200xf32, #tpu.memory_space<vmem>>, vector<16x200xf32>
    %c0_1 = arith.constant 0 : index
    %c0_2 = arith.constant 0 : index
    %1 = vector.load %arg2[%c0_1, %c0_2] : memref<200x5xf32, #tpu.memory_space<vmem>>, vector<200x5xf32>
    %cst = arith.constant dense<0.000000e+00> : vector<16x5xf32>
    %2 = tpu.matmul %0, %1, %cst {dimension_numbers = #tpu.dot_dimension_numbers<[1], [0], [0], [1], [0, 0, 1, 1], [], []>} : vector<16x200xf32>, vector<200x5xf32>, vector<16x5xf32> -> vector<16x5xf32>
    %c0_3 = arith.constant 0 : index
    %c0_4 = arith.constant 0 : index
    %3 = vector.load %arg3[%c0_3, %c0_4] : memref<1x5xf32, #tpu.memory_space<vmem>>, vector<1x5xf32>
    %4 = vector.broadcast %3 : vector<1x5xf32> to vector<16x5xf32>
    %5 = arith.addf %2, %4 : vector<16x5xf32>
    %cst_5 = arith.constant 0.000000e+00 : f32
    %6 = vector.broadcast %cst_5 : f32 to vector<16x5xf32>
    %7 = arith.maximumf %5, %6 : vector<16x5xf32>
    %c0_6 = arith.constant 0 : index
    %c0_7 = arith.constant 0 : index
    %8 = vector.load %arg4[%c0_6, %c0_7] : memref<5x10xf32, #tpu.memory_space<vmem>>, vector<5x10xf32>
    %cst_8 = arith.constant dense<0.000000e+00> : vector<16x10xf32>
    %9 = tpu.matmul %7, %8, %cst_8 {dimension_numbers = #tpu.dot_dimension_numbers<[1], [0], [0], [1], [0, 0, 1, 1], [], []>} : vector<16x5xf32>, vector<5x10xf32>, vector<16x10xf32> -> vector<16x10xf32>
    %c0_9 = arith.constant 0 : index
    %c0_10 = arith.constant 0 : index
    %10 = vector.load %arg5[%c0_9, %c0_10] : memref<1x10xf32, #tpu.memory_space<vmem>>, vector<1x10xf32>
    %11 = vector.broadcast %10 : vector<1x10xf32> to vector<16x10xf32>
    %12 = arith.addf %9, %11 : vector<16x10xf32>
    %cst_11 = arith.constant 0.000000e+00 : f32
    %13 = vector.broadcast %cst_11 : f32 to vector<16x10xf32>
    %14 = arith.maximumf %12, %13 : vector<16x10xf32>
    %c0_12 = arith.constant 0 : index
    %c0_13 = arith.constant 0 : index
    %15 = vector.load %arg6[%c0_12, %c0_13] : memref<10x128xf32, #tpu.memory_space<vmem>>, vector<10x128xf32>
    %cst_14 = arith.constant dense<0.000000e+00> : vector<16x128xf32>
    %16 = tpu.matmul %14, %15, %cst_14 {dimension_numbers = #tpu.dot_dimension_numbers<[1], [0], [0], [1], [0, 0, 1, 1], [], []>} : vector<16x10xf32>, vector<10x128xf32>, vector<16x128xf32> -> vector<16x128xf32>
    %c0_15 = arith.constant 0 : index
    %c0_16 = arith.constant 0 : index
    %17 = vector.load %arg7[%c0_15, %c0_16] : memref<1x128xf32, #tpu.memory_space<vmem>>, vector<1x128xf32>
    %18 = vector.broadcast %17 : vector<1x128xf32> to vector<16x128xf32>
    %19 = arith.addf %16, %18 : vector<16x128xf32>
    %c0_17 = arith.constant 0 : index
    %c0_18 = arith.constant 0 : index
    %20 = vector.load %arg8[%c0_17, %c0_18] : memref<16x128xf32, #tpu.memory_space<vmem>>, vector<16x128xf32>
    tpu.vector_store %arg8[%c0_17, %c0_18], %19 {strides = array<i32>} : memref<16x128xf32, #tpu.memory_space<vmem>>, vector<16x128xf32>,
    return
  }
  func.func @transform_0(%arg0: i32) -> (i32, i32) {
    %c0_i32 = arith.constant 0 : i32
    %c0_i32_0 = arith.constant 0 : i32
    return %arg0, %c0_i32 : i32, i32
  }
  func.func @transform_1(%arg0: i32) -> (i32, i32) {
    %c0_i32 = arith.constant 0 : i32
    %c0_i32_0 = arith.constant 0 : i32
    %c0_i32_1 = arith.constant 0 : i32
    return %c0_i32, %c0_i32_0 : i32, i32
  }
  func.func @transform_2(%arg0: i32) -> (i32, i32) {
    %c0_i32 = arith.constant 0 : i32
    %c0_i32_0 = arith.constant 0 : i32
    %c0_i32_1 = arith.constant 0 : i32
    return %c0_i32, %c0_i32_0 : i32, i32
  }
  func.func @transform_3(%arg0: i32) -> (i32, i32) {
    %c0_i32 = arith.constant 0 : i32
    %c0_i32_0 = arith.constant 0 : i32
    %c0_i32_1 = arith.constant 0 : i32
    return %c0_i32, %c0_i32_0 : i32, i32
  }
  func.func @transform_4(%arg0: i32) -> (i32, i32) {
    %c0_i32 = arith.constant 0 : i32
    %c0_i32_0 = arith.constant 0 : i32
    %c0_i32_1 = arith.constant 0 : i32
    return %c0_i32, %c0_i32_0 : i32, i32
  }
  func.func @transform_5(%arg0: i32) -> (i32, i32) {
    %c0_i32 = arith.constant 0 : i32
    %c0_i32_0 = arith.constant 0 : i32
    %c0_i32_1 = arith.constant 0 : i32
    return %c0_i32, %c0_i32_0 : i32, i32
  }
  func.func @transform_6(%arg0: i32) -> (i32, i32) {
    %c0_i32 = arith.constant 0 : i32
    %c0_i32_0 = arith.constant 0 : i32
    %c0_i32_1 = arith.constant 0 : i32
    return %c0_i32, %c0_i32_0 : i32, i32
  }
  func.func @transform_7(%arg0: i32) -> (i32, i32) {
    %c0_i32 = arith.constant 0 : i32
    %c0_i32_0 = arith.constant 0 : i32
    return %arg0, %c0_i32 : i32, i32
  }
}

</mosaic_0001>

<bundles_post_ra>
// kernel: tpu_custom_call.1
= control target key start
LH: loop header
LB: loop body
LE: loop exit
PB: predicated region body
PF: predicated region fallthrough
CT: control target
= control target key end

     0   :  { %v458_v3 = vmov 0.0|0.0   ;;  %vm63_vm0 = vcmask 588800   ;;  %s623_s0 = inlined_call_operand.vmem [shape: f32[16,200], index: 0, kind: input, shape index: {}]   ;;  %s624_s1 = inlined_call_operand.vmem [shape: f32[200,5], index: 1, kind: input, shape index: {}]   ;;  %s625_s2 = inlined_call_operand.vmem [shape: f32[1,5], index: 2, kind: input, shape index: {}]   ;;  %s626_s3 = inlined_call_operand.vmem [shape: f32[5,10], index: 3, kind: input, shape index: {}]   ;;  %s627_s4 = inlined_call_operand.vmem [shape: f32[1,10], index: 4, kind: input, shape index: {}]   ;;  %s628_s5 = inlined_call_operand.vmem [shape: f32[10,128], index: 5, kind: input, shape index: {}]   ;;  %s629_s6 = inlined_call_operand.vmem [shape: f32[1,128], index: 6, kind: input, shape index: {}]   ;;  %s630_s7 = inlined_call_operand.hbm [shape: f32[16,128], index: 7, kind: output, shape index: {}]  }
   0x1   :  { %v31_v0 = vld [vmem:[%s624_s1] sm:$0xff]  ;;  %v32_v1 = vld [vmem:[%s624_s1 + $0x8] sm:$0xff]  ;;  %v33_v2 = vld [vmem:[%s624_s1 + $0x10] sm:$0xff]  ;;  %386 = vmatprep.subr.bf16.mxu0 %v458_v3 }
   0x2   :  { %v387_v4 = vpack.c.bf16 %v32_v1, %v31_v0  ;;  %v34_v5 = vld [vmem:[%s624_s1 + $0x18] sm:$0xff]  ;;  %v35_v7 = vld [vmem:[%s624_s1 + $0x20] sm:$0xff]  ;;  %v36_v8 = vld [vmem:[%s624_s1 + $0x28] sm:$0xff] }
   0x3   :  { %v390_v6 = vpack.c.bf16 %v34_v5, %v33_v2  ;;  %v393_v9 = vpack.c.bf16 %v36_v8, %v35_v7  ;;  %v37_v10 = vld [vmem:[%s624_s1 + $0x30] sm:$0xff]  ;;  %v38_v11 = vld [vmem:[%s624_s1 + $0x38] sm:$0xff]  ;;  %v28_v12 = vld [vmem:[%s623_s0 + $0x8] sm:$0xff] }
   0x4   :  { %388 = vmatpush1.bf16.msra.mxu0 %v387_v4  ;;  %357 = vmatprep.mubr.msk.f32.mxu0 %vm63_vm0, %v28_v12 }
   0x5   :  { %389 = vmatprep.subr.bf16.mxu0 %v458_v3 }
   0x8   :  { %391 = vmatpush1.bf16.msra.mxu0 %v390_v6 }
   0x9   :  { %392 = vmatprep.subr.bf16.mxu0 %v458_v3 }
   0xa   :  { %12 = vsyncpa [#allocation3], 0  ;;  %v396_v13 = vpack.c.bf16 %v38_v11, %v37_v10  ;;  %v39_v14 = vld [vmem:[%s624_s1 + $0x40] sm:$0xff]  ;;  %v40_v15 = vld [vmem:[%s624_s1 + $0x48] sm:$0xff]  ;;  %v459_v38 = vmov 0.0   ;;  %vm162_vm1 = vcmask 1044480  }
   0xb   :  { %v399_v16 = vpack.c.bf16 %v40_v15, %v39_v14  ;;  %v41_v17 = vld [vmem:[%s624_s1 + $0x50] sm:$0xff]  ;;  %v42_v18 = vld [vmem:[%s624_s1 + $0x58] sm:$0xff]  ;;  %v43_v20 = vld [vmem:[%s624_s1 + $0x60] sm:$0xff]  ;;  %vm155_vm2 = vcmask 39936   ;;  %vm259_vm3 = vcmask 1041408   ;;  %vm460_vm4 = vmmov 1  }
   0xc   :  { %394 = vmatpush1.bf16.msra.mxu0 %v393_v9  ;;  %v402_v19 = vpack.c.bf16 %v42_v18, %v41_v17  ;;  %v44_v21 = vld [vmem:[%s624_s1 + $0x68] sm:$0xff]  ;;  %v45_v23 = vld [vmem:[%s624_s1 + $0x70] sm:$0xff]  ;;  %v46_v24 = vld [vmem:[%s624_s1 + $0x78] sm:$0xff]  ;;  %vm252_vm6 = vcmask 80896   ;;  %s461_s20 = smov [#allocation2]  }
   0xd   :  { %395 = vmatprep.subr.bf16.mxu0 %v458_v3  ;;  %v405_v22 = vpack.c.bf16 %v44_v21, %v43_v20  ;;  %v408_v25 = vpack.c.bf16 %v46_v24, %v45_v23  ;;  %v47_v26 = vld [vmem:[%s624_s1 + $0x80] sm:$0xff]  ;;  %v48_v27 = vld [vmem:[%s624_s1 + $0x88] sm:$0xff]  ;;  %v49_v29 = vld [vmem:[%s624_s1 + $0x90] sm:$0xff]  ;;  %s345_s21 = sshll.u32 %s461_s20, 4  ;;  %s346_s21 = int_to_ptr.vmem [resolvable:$true] %s345_s21 }
   0xe   :  { %v411_v28 = vpack.c.bf16 %v48_v27, %v47_v26  ;;  %v50_v30 = vld [vmem:[%s624_s1 + $0x98] sm:$0xff]  ;;  %v51_v32 = vld [vmem:[%s624_s1 + $0xa0] sm:$0xff]  ;;  %v52_v33 = vld [vmem:[%s624_s1 + $0xa8] sm:$0xff]  ;;  %p439_p1 = scmp.lt.s32.totalorder %s346_s21, %s346_s21 }
   0xf   :  { %v414_v31 = vpack.c.bf16 %v50_v30, %v49_v29  ;;  %v417_v34 = vpack.c.bf16 %v52_v33, %v51_v32  ;;  %v53_v35 = vld [vmem:[%s624_s1 + $0xb0] sm:$0xff]  ;;  %v54_v36 = vld [vmem:[%s624_s1 + $0xb8] sm:$0xff]  ;;  %v55_v39 = vld [vmem:[%s624_s1 + $0xc0] sm:$0xff] }
  0x10   :  { %397 = vmatpush1.bf16.msra.mxu0 %v396_v13  ;;  %v420_v37 = vpack.c.bf16 %v54_v36, %v53_v35  ;;  %v27_v40 = vld [vmem:[%s623_s0] sm:$0xff]  ;;  %v30_v41 = vld [vmem:[%s623_s0 + $0x18] sm:$0xff]  ;;  %v29_v42 = vld [vmem:[%s623_s0 + $0x10] sm:$0xff] }
  0x11   :  { %398 = vmatprep.subr.bf16.mxu0 %v458_v3  ;;  %v147_v43 = vld [vmem:[%s626_s3] sm:$0x1f]  ;;  %v244_v54 = vld [vmem:[%s628_s5 + $0x8] sm:$0x3]  ;;  %vm423_vm5 = vmpackc.low %vm259_vm3, %vm460_vm4 }
  0x12   :  { %374 = vmatprep.subr.msk.mxu1 %vm162_vm1, %v147_v43  ;;  %v356_v44 = vld [vmem:[%s625_s2] ss:$0 sm:$0xff] }
  0x13   :  { %375 = vmatpush3.msk.msra.mxu1 %vm162_vm1, %v147_v43  ;;  %v243_v53 = vld [vmem:[%s628_s5] sm:$0xff] }
  0x14   :  { %400 = vmatpush1.bf16.msra.mxu0 %v399_v16  ;;  %v422_v55 = vpack.c.bf16 %v244_v54, %v243_v53  ;;  %v359_v56 = vld [vmem:[%s627_s4] ss:$0 sm:$0xff]  ;;  %s434_s4 = scalar_lea.vmem %s346_s21, 256 }
  0x15   :  { %401 = vmatprep.subr.bf16.mxu0 %v458_v3  ;;  %v363_v63 = vld [vmem:[%s629_s6] ss:$0 sm:$0xff]  ;;  %p435_p0 = scmp.ne.s32.totalorder %s346_s21, %s434_s4  ;;  %p440_p2 = scmp.lt.s32.totalorder %s434_s4, %s434_s4 }
  0x16   :  { %424 = vmatprep.subr.msk.bf16.mxu1 %vm423_vm5, %v422_v55 }
  0x17   :  { %p441_p3 = por %p440_p2, %p439_p1 }
  0x18   :  { %403 = vmatpush1.bf16.msra.mxu0 %v402_v19 }
  0x19   :  { %404 = vmatprep.subr.bf16.mxu0 %v458_v3  ;;  %p442_p4 = pnand %p441_p3, %p435_p0 }
  0x1c   :  { %406 = vmatpush1.bf16.msra.mxu0 %v405_v22 }
  0x1d   :  { %407 = vmatprep.subr.bf16.mxu0 %v458_v3 }
  0x20   :  { %409 = vmatpush1.bf16.msra.mxu0 %v408_v25 }
  0x21   :  { %410 = vmatprep.subr.bf16.mxu0 %v458_v3 }
  0x24   :  { %412 = vmatpush1.bf16.msra.mxu0 %v411_v28 }
  0x25   :  { %413 = vmatprep.subr.bf16.mxu0 %v458_v3 }
  0x28   :  { %415 = vmatpush1.bf16.msra.mxu0 %v414_v31 }
  0x29   :  { %416 = vmatprep.subr.bf16.mxu0 %v458_v3 }
  0x2c   :  { %418 = vmatpush1.bf16.msra.mxu0 %v417_v34 }
  0x2d   :  { %419 = vmatprep.subr.bf16.mxu0 %v458_v3 }
  0x30   :  { %421 = vmatpush1.bf16.msra.mxu0 %v420_v37 }
  0x31   :  { %118 = vmatprep.subr.mxu0 %v459_v38 }
  0x34   :  { %119 = vmatpush1.msra.mxu0 %v55_v39 }
  0x35   :  { %135 = vmatmul.mubr.f32.vlgmr.msra.gmra.mrb[0].mxu0 %v27_v40 }
  0x36   :  { %358 = vmatprep.mubr.msk.f32.mxu0 %vm63_vm0, %v30_v41 }
  0x39   :  { %140 = vmatmul.mubr.f32.gmra.mrb[2].mxu0 %v29_v42 }
 0x108   :  { %v136_v45 = vpop.f32.mrb[0].mxu0 }
 0x109   :  { %v137_v46 = vadd.f32 %v356_v44, %v136_v45  ;;  %v138_v47 = vpop.f32.mrb[1].mxu0 }
 0x10b   :  { %v145_v48 = vmax.f32 %v137_v46, 0.0 }
 0x10c   :  { %v141_v49 = vpop.f32.mrb[2].mxu0 }
 0x10d   :  { %v142_v50 = vadd.f32 %v356_v44, %v141_v49  ;;  %v143_v51 = vpop.f32.mrb[3].mxu0  ;;  %376 = vmatprep.mubr.msk.f32.mxu1 %vm155_vm2, %v145_v48 }
 0x10f   :  { %v146_v52 = vmax.f32 %v142_v50, 0.0 }
 0x111   :  { %377 = vmatmul.mubr.msk.f32.vlgmr.msra.gmra.mrb[0].mxu1 %vm155_vm2, %v146_v52 }
 0x112   :  { %427 = vmatpush3.bf16.msk.msra.mxu1 %vm423_vm5, %v422_v55 }
 0x1e4   :  { %v378_v57 = vpop.f32.mrb[0].mxu1 }
 0x1e5   :  { %v238_v58 = vadd.f32 %v378_v57, %v359_v56  ;;  %v232_v59 = vpop.f32.mrb[1].mxu1 }
 0x1e6   :  { %v233_v60 = vadd.f32 %v359_v56, %v232_v59 }
 0x1e7   :  { %v242_v62 = vmax.f32 %v238_v58, 0.0 }
 0x1e8   :  { %v241_v61 = vmax.f32 %v233_v60, 0.0 }
 0x1ea   :  { %383 = vmatprep.mubr.msk.f32.mxu1 %vm252_vm6, %v241_v61 }
 0x1eb   :  { %384 = vmatmul.mubr.msk.f32.vlgmr.msra.gmra.mrb[2].mxu1 %vm252_vm6, %v242_v62 }
 0x2be   :  { %v385_v0 = vpop.f32.mrb[2].mxu1 }
 0x2bf   :  { %v335_v1 = vadd.f32 %v385_v0, %v363_v63  ;;  %v329_v2 = vpop.f32.mrb[3].mxu1 }
 0x2c0   :  { %v330_v3 = vadd.f32 %v363_v63, %v329_v2 }
 0x2c1   :  { %339 = vst [vmem:[#allocation2 + $0x8] sm:$0xff] %v335_v1 }
 0x2c2   :  { %338 = vst [vmem:[#allocation2] sm:$0xff] %v330_v3 }
 0x2c3   :  { %445 = shalt.err (!%p442_p4)
}
 0x2c4   :  { %s446_s6 = scalar_lea.hbm %s630_s7, 256 }
 0x2c5   :  { %p447_p5 = scmp.ne.s32.totalorder %s630_s7, %s446_s6  ;;  %p450_p6 = scmp.lt.u32.totalorder %s446_s6, %s630_s7 }
 0x2c7   :  { %p452_p7 = pnand %p450_p6, %p447_p5 }
 0x2c9   :  { %455 = shalt.err (!%p452_p7)
}
 0x2ca   :  { %s462_s28 = smov 128   ;;  %s463_s29 = smov 8  }
 0x2cb   :  { %351 = dma.vmem_to_hbm [thread:$0]  %s346_s21, 256, %s630_s7, [#allocation3], %s462_s28, %s462_s28, %s463_s29  }
 0x2cc   :  { %456 = dma.done.wait [#allocation3], 256  }
 0x2cd   :  { %457 = vsyncadd [#allocation3], 4294967040 }
 0x2ce   :  { %355 = vsyncpa [#allocation3], 1 }

</bundles_post_ra>
